<compile_context>
chip_gen: v6e
topology: v6e:2x2x1
jax: 0.10.0
libtpu: 0.0.40
codegen_flags: <defaults>
</compile_context>

<pallas_src>
import functools
import math

import numpy as np

import jax
import jax.numpy as jnp
from jax import lax
from jax.experimental import pallas as pl
from jax.experimental.pallas import tpu as pltpu


# ---------------------------------------------------------------------------
# Kernel 1: conv (shifted-tap matmuls, bf16 -> f32 acc) + fused per-channel stats
# ---------------------------------------------------------------------------
def conv_stats_kernel(x_ref, w_ref, mask_ref, y_ref, stat_ref, *, tap_starts, hw, nb):
    # x_ref:    (nb, Cin, HWp)   bf16   (flat spatial axis, zero halo of S on both sides)
    # w_ref:    (T,  Cout, Cin)  bf16   resident
    # mask_ref: (T,  1,   HW)    bf16   resident (column-wrap validity per tap)
    # y_ref:    (nb, Cout, HW)   f32    conv output WITHOUT bias (bias folded into BN affine)
    # stat_ref: (1,  Cout, 2)    f32    per-block [sum, sum_of_squares] per channel
    T = len(tap_starts)
    cout = w_ref.shape[1]

    # hoist resident loads out of the per-image loop
    w_taps = [w_ref[t] for t in range(T)]       # (Cout, Cin)
    masks = [mask_ref[t] for t in range(T)]     # (1, HW)

    s_sum = jnp.zeros((cout, 1), jnp.float32)
    s_sq = jnp.zeros((cout, 1), jnp.float32)

    for i in range(nb):
        x_img = x_ref[i]                        # (Cin, HWp) bf16
        acc = jnp.zeros((cout, hw), jnp.float32)
        for t in range(T):
            st = tap_starts[t]
            xs = x_img[:, st:st + hw] * masks[t]                     # (Cin, HW) bf16
            acc = acc + jnp.dot(w_taps[t], xs,
                                preferred_element_type=jnp.float32)  # (Cout, HW) f32
        y_ref[i] = acc
        s_sum = s_sum + jnp.sum(acc, axis=1, keepdims=True)
        s_sq = s_sq + jnp.sum(acc * acc, axis=1, keepdims=True)

    stat_ref[0] = jnp.concatenate([s_sum, s_sq], axis=1)             # (Cout, 2)


# ---------------------------------------------------------------------------
# Kernel 2: fused BatchNorm affine (precomputed scale/shift) + inverted dropout
# ---------------------------------------------------------------------------
def bn_dropout_kernel(seed_ref, y_ref, scale_ref, shift_ref, o_ref, *, p, hw, cout, nb):
    # y_ref: (nb, Cout, HW) f32;  scale/shift: (1, Cout, 1) f32;  seed_ref: SMEM (1,) i32
    val = y_ref[...] * scale_ref[...] + shift_ref[...]

    if p > 0.0:
        shape = val.shape
        base = pl.program_id(0) * (nb * cout * hw)
        idx = (lax.broadcasted_iota(jnp.int32, shape, 0) * (cout * hw)
               + lax.broadcasted_iota(jnp.int32, shape, 1) * hw
               + lax.broadcasted_iota(jnp.int32, shape, 2)
               + base)
        # counter-based hash PRNG (lowbias32), keyed on global element index + seed
        h = idx.astype(jnp.uint32) + seed_ref[0].astype(jnp.uint32) * jnp.uint32(0x9E3779B1)
        h = h ^ (h >> 16)
        h = h * jnp.uint32(0x7FEB352D)
        h = h ^ (h >> 15)
        h = h * jnp.uint32(0x846CA68B)
        h = h ^ (h >> 16)
        r = (h >> 8).astype(jnp.int32)                 # uniform in [0, 2^24)
        thresh = jnp.int32(int(round(p * (1 << 24))))
        val = jnp.where(r >= thresh, val * jnp.float32(1.0 / (1.0 - p)), jnp.float32(0.0))

    o_ref[...] = val


# ---------------------------------------------------------------------------
# Wrapper
# ---------------------------------------------------------------------------
def _build_taps(H, W, KH, KW):
    ph, pw = (KH - 1) // 2, (KW - 1) // 2
    S = ph * W + pw
    HW = H * W
    wpos = np.arange(HW) % W
    starts, masks = [], []
    for ki in range(KH):
        for kj in range(KW):
            dh, dw = ki - ph, kj - pw
            starts.append(S + dh * W + dw)
            m = ((wpos + dw >= 0) & (wpos + dw < W)).astype(np.float32)
            masks.append(m.reshape(1, HW))
    return tuple(starts), np.stack(masks, axis=0)      # (T, 1, HW)


def cnn_layer(x, conv_w, conv_b, gamma, beta, p_drop, seed, eps=1e-5, images_per_block=None):
    N, Cin, H, W = x.shape
    Cout, Cin2, KH, KW = conv_w.shape
    assert Cin2 == Cin and KH % 2 == 1 and KW % 2 == 1
    HW = H * W
    ph, pw = (KH - 1) // 2, (KW - 1) // 2
    S = ph * W + pw
    HWp = HW + 2 * S
    T = KH * KW

    tap_starts, masks_np = _build_taps(H, W, KH, KW)
    masks = jnp.asarray(masks_np, dtype=jnp.bfloat16)
    w_taps = jnp.transpose(conv_w, (2, 3, 0, 1)).reshape(T, Cout, Cin).astype(jnp.bfloat16)

    # pick a block size (images per grid step) targeting a few MiB of VMEM per step
    if images_per_block is None:
        per_img = Cin * HWp * 2 + 2 * Cout * HW * 4
        images_per_block = max(1, min(N, 8, (4 << 20) // max(per_img, 1)))
    nb = images_per_block
    G = pl.cdiv(N, nb)
    N_pad = G * nb

    # NCHW -> flat (N, Cin, HW) (free) -> bf16, zero halo of S lanes on each side.
    # Padded batch images are all-zero; since kernel 1 omits the conv bias they
    # contribute exactly zero to the fused statistics.
    x_flat = x.reshape(N, Cin, HW).astype(jnp.bfloat16)
    x_fp = jnp.pad(x_flat, ((0, N_pad - N), (0, 0), (S, S)))

    y, stats = pl.pallas_call(
        functools.partial(conv_stats_kernel, tap_starts=tap_starts, hw=HW, nb=nb),
        grid=(G,),
        in_specs=[
            pl.BlockSpec((nb, Cin, HWp), lambda i: (i, 0, 0)),
            pl.BlockSpec((T, Cout, Cin), lambda i: (0, 0, 0)),   # resident
            pl.BlockSpec((T, 1, HW), lambda i: (0, 0, 0)),       # resident
        ],
        out_specs=(
            pl.BlockSpec((nb, Cout, HW), lambda i: (i, 0, 0)),   # lane-dense (HW lanes)
            pl.BlockSpec((1, Cout, 2), lambda i: (i, 0, 0)),     # per-block partial stats
        ),
        out_shape=(
            jax.ShapeDtypeStruct((N_pad, Cout, HW), jnp.float32),
            jax.ShapeDtypeStruct((G, Cout, 2), jnp.float32),
        ),
        compiler_params=pltpu.CompilerParams(
            dimension_semantics=("parallel",),
            vmem_limit_bytes=32 * 1024 * 1024,
        ),
    )(x_fp, w_taps, masks)

    # Tiny per-channel reduction + affine fold (conv bias + batch-stat BN + gamma/beta).
    M = N * HW                                   # true element count per channel
    st = jnp.sum(stats, axis=0)                  # (Cout, 2)
    mean_nb = st[:, 0] / M                       # mean of conv output WITHOUT bias
    var = jnp.maximum(st[:, 1] / M - mean_nb * mean_nb, 0.0)   # bias does not change var
    mean = mean_nb + conv_b.astype(jnp.float32)  # mean of (conv + bias), what torch BN sees
    scale = gamma.astype(jnp.float32) * lax.rsqrt(var + eps)
    shift = beta.astype(jnp.float32) + (conv_b.astype(jnp.float32) - mean) * scale

    seed_arr = jnp.asarray([seed], dtype=jnp.int32)
    out = pl.pallas_call(
        functools.partial(bn_dropout_kernel, p=float(p_drop), hw=HW, cout=Cout, nb=nb),
        grid=(G,),
        in_specs=[
            pl.BlockSpec(memory_space=pltpu.MemorySpace.SMEM),     # seed scalar
            pl.BlockSpec((nb, Cout, HW), lambda i: (i, 0, 0)),
            pl.BlockSpec((1, Cout, 1), lambda i: (0, 0, 0)),       # resident scale
            pl.BlockSpec((1, Cout, 1), lambda i: (0, 0, 0)),       # resident shift
        ],
        out_specs=pl.BlockSpec((nb, Cout, HW), lambda i: (i, 0, 0)),
        out_shape=jax.ShapeDtypeStruct((N_pad, Cout, HW), jnp.float32),
        compiler_params=pltpu.CompilerParams(
            dimension_semantics=("parallel",),
            vmem_limit_bytes=32 * 1024 * 1024,
        ),
    )(seed_arr, y, scale.reshape(1, Cout, 1), shift.reshape(1, Cout, 1))

    # (N, Cout, HW) is already NCHW; just drop batch padding (no-op when nb | N) and reshape.
    return out[:N].reshape(N, Cout, H, W)


# ---------------------------------------------------------------------------
# Plain-JAX reference for the deterministic part (conv + train-mode BN)
# ---------------------------------------------------------------------------
def _reference_conv_bn(x, w, b, gamma, beta, eps):
    y = lax.conv_general_dilated(
        x, w, window_strides=(1, 1), padding="SAME",
        dimension_numbers=("NCHW", "OIHW", "NCHW")) + b.reshape(1, -1, 1, 1)
    mean = y.mean(axis=(0, 2, 3), keepdims=True)
    var = ((y - mean) ** 2).mean(axis=(0, 2, 3), keepdims=True)
    return (y - mean) * lax.rsqrt(var + eps) * gamma.reshape(1, -1, 1, 1) + beta.reshape(1, -1, 1, 1)


if __name__ == "__main__":
    # module config: CNN_layer(in_channels=4, out_channels=8, kernel_size=(3,3), dropout=0.1)
    N, Cin, H, W = 2, 4, 16, 16
    Cout, KH, KW = 8, 3, 3
    p_drop = 0.1

    key = jax.random.PRNGKey(0)
    kx, kw, kb = jax.random.split(key, 3)
    x = jax.random.normal(kx, (N, Cin, H, W), dtype=jnp.float32)

    fan_in = Cin * KH * KW
    conv_w = jax.random.normal(kw, (Cout, Cin, KH, KW), dtype=jnp.float32) / math.sqrt(fan_in)
    conv_b = jax.random.uniform(kb, (Cout,), dtype=jnp.float32,
                                minval=-1.0 / math.sqrt(fan_in),
                                maxval=1.0 / math.sqrt(fan_in))
    gamma = jnp.ones((Cout,), jnp.float32)   # BatchNorm2d weight init
    beta = jnp.zeros((Cout,), jnp.float32)   # BatchNorm2d bias init

    # correctness check of the deterministic path (dropout disabled); bf16-conv tolerance
    ref = _reference_conv_bn(x, conv_w, conv_b, gamma, beta, eps=1e-5)
    got = cnn_layer(x, conv_w, conv_b, gamma, beta, p_drop=0.0, seed=0)
    err = float(jnp.max(jnp.abs(got - ref)))
    assert err < 1e-1, f"max abs error vs reference: {err}"

    out = cnn_layer(x, conv_w, conv_b, gamma, beta, p_drop, seed=0)
    jax.block_until_ready(out)
    assert out.shape == (N, Cout, H, W)
    print("KERNEL_OK")
</pallas_src>

<mosaic_0001>
module attributes {stable_mosaic.version = 11 : i64} {
  func.func @conv_stats_kernel(%arg0: i32, %arg1: memref<2x4x290xbf16, #tpu.memory_space<vmem>>, %arg2: memref<9x8x4xbf16, #tpu.memory_space<vmem>>, %arg3: memref<9x1x256xbf16, #tpu.memory_space<vmem>>, %arg4: memref<2x8x256xf32, #tpu.memory_space<vmem>>, %arg5: memref<1x8x2xf32, #tpu.memory_space<vmem>>) attributes {dimension_semantics = [#tpu.dimension_semantics<parallel>], iteration_bounds = array<i64: 1>, scalar_prefetch = 0 : i64, scratch_operands = 0 : i64, tpu.core_type = #tpu.core_type<tc>, window_params = [{transform_indices = @transform_0, window_bounds = array<i64: 2, 4, 290>}, {pipeline_mode = #tpu.pipeline_mode<synchronous>, transform_indices = @transform_1, window_bounds = array<i64: 9, 8, 4>}, {pipeline_mode = #tpu.pipeline_mode<synchronous>, transform_indices = @transform_2, window_bounds = array<i64: 9, 1, 256>}, {transform_indices = @transform_3, window_bounds = array<i64: 2, 8, 256>}, {transform_indices = @transform_4, window_bounds = array<i64: 1, 8, 2>}]} {
    %c0 = arith.constant 0 : index
    %c0_0 = arith.constant 0 : index
    %c0_1 = arith.constant 0 : index
    %0 = vector.load %arg2[%c0, %c0_0, %c0_1] : memref<9x8x4xbf16, #tpu.memory_space<vmem>>, vector<1x8x4xbf16>
    %1 = vector.shape_cast %0 : vector<1x8x4xbf16> to vector<8x4xbf16>
    %c1 = arith.constant 1 : index
    %c0_2 = arith.constant 0 : index
    %c0_3 = arith.constant 0 : index
    %2 = vector.load %arg2[%c1, %c0_2, %c0_3] : memref<9x8x4xbf16, #tpu.memory_space<vmem>>, vector<1x8x4xbf16>
    %3 = vector.shape_cast %2 : vector<1x8x4xbf16> to vector<8x4xbf16>
    %c2 = arith.constant 2 : index
    %c0_4 = arith.constant 0 : index
    %c0_5 = arith.constant 0 : index
    %4 = vector.load %arg2[%c2, %c0_4, %c0_5] : memref<9x8x4xbf16, #tpu.memory_space<vmem>>, vector<1x8x4xbf16>
    %5 = vector.shape_cast %4 : vector<1x8x4xbf16> to vector<8x4xbf16>
    %c3 = arith.constant 3 : index
    %c0_6 = arith.constant 0 : index
    %c0_7 = arith.constant 0 : index
    %6 = vector.load %arg2[%c3, %c0_6, %c0_7] : memref<9x8x4xbf16, #tpu.memory_space<vmem>>, vector<1x8x4xbf16>
    %7 = vector.shape_cast %6 : vector<1x8x4xbf16> to vector<8x4xbf16>
    %c4 = arith.constant 4 : index
    %c0_8 = arith.constant 0 : index
    %c0_9 = arith.constant 0 : index
    %8 = vector.load %arg2[%c4, %c0_8, %c0_9] : memref<9x8x4xbf16, #tpu.memory_space<vmem>>, vector<1x8x4xbf16>
    %9 = vector.shape_cast %8 : vector<1x8x4xbf16> to vector<8x4xbf16>
    %c5 = arith.constant 5 : index
    %c0_10 = arith.constant 0 : index
    %c0_11 = arith.constant 0 : index
    %10 = vector.load %arg2[%c5, %c0_10, %c0_11] : memref<9x8x4xbf16, #tpu.memory_space<vmem>>, vector<1x8x4xbf16>
    %11 = vector.shape_cast %10 : vector<1x8x4xbf16> to vector<8x4xbf16>
    %c6 = arith.constant 6 : index
    %c0_12 = arith.constant 0 : index
    %c0_13 = arith.constant 0 : index
    %12 = vector.load %arg2[%c6, %c0_12, %c0_13] : memref<9x8x4xbf16, #tpu.memory_space<vmem>>, vector<1x8x4xbf16>
    %13 = vector.shape_cast %12 : vector<1x8x4xbf16> to vector<8x4xbf16>
    %c7 = arith.constant 7 : index
    %c0_14 = arith.constant 0 : index
    %c0_15 = arith.constant 0 : index
    %14 = vector.load %arg2[%c7, %c0_14, %c0_15] : memref<9x8x4xbf16, #tpu.memory_space<vmem>>, vector<1x8x4xbf16>
    %15 = vector.shape_cast %14 : vector<1x8x4xbf16> to vector<8x4xbf16>
    %c8 = arith.constant 8 : index
    %c0_16 = arith.constant 0 : index
    %c0_17 = arith.constant 0 : index
    %16 = vector.load %arg2[%c8, %c0_16, %c0_17] : memref<9x8x4xbf16, #tpu.memory_space<vmem>>, vector<1x8x4xbf16>
    %17 = vector.shape_cast %16 : vector<1x8x4xbf16> to vector<8x4xbf16>
    %c0_18 = arith.constant 0 : index
    %c0_19 = arith.constant 0 : index
    %c0_20 = arith.constant 0 : index
    %18 = vector.load %arg3[%c0_18, %c0_19, %c0_20] : memref<9x1x256xbf16, #tpu.memory_space<vmem>>, vector<1x1x256xbf16>
    %19 = vector.shape_cast %18 : vector<1x1x256xbf16> to vector<1x256xbf16>
    %c1_21 = arith.constant 1 : index
    %c0_22 = arith.constant 0 : index
    %c0_23 = arith.constant 0 : index
    %20 = vector.load %arg3[%c1_21, %c0_22, %c0_23] : memref<9x1x256xbf16, #tpu.memory_space<vmem>>, vector<1x1x256xbf16>
    %21 = vector.shape_cast %20 : vector<1x1x256xbf16> to vector<1x256xbf16>
    %c2_24 = arith.constant 2 : index
    %c0_25 = arith.constant 0 : index
    %c0_26 = arith.constant 0 : index
    %22 = vector.load %arg3[%c2_24, %c0_25, %c0_26] : memref<9x1x256xbf16, #tpu.memory_space<vmem>>, vector<1x1x256xbf16>
    %23 = vector.shape_cast %22 : vector<1x1x256xbf16> to vector<1x256xbf16>
    %c3_27 = arith.constant 3 : index
    %c0_28 = arith.constant 0 : index
    %c0_29 = arith.constant 0 : index
    %24 = vector.load %arg3[%c3_27, %c0_28, %c0_29] : memref<9x1x256xbf16, #tpu.memory_space<vmem>>, vector<1x1x256xbf16>
    %25 = vector.shape_cast %24 : vector<1x1x256xbf16> to vector<1x256xbf16>
    %c4_30 = arith.constant 4 : index
    %c0_31 = arith.constant 0 : index
    %c0_32 = arith.constant 0 : index
    %26 = vector.load %arg3[%c4_30, %c0_31, %c0_32] : memref<9x1x256xbf16, #tpu.memory_space<vmem>>, vector<1x1x256xbf16>
    %27 = vector.shape_cast %26 : vector<1x1x256xbf16> to vector<1x256xbf16>
    %c5_33 = arith.constant 5 : index
    %c0_34 = arith.constant 0 : index
    %c0_35 = arith.constant 0 : index
    %28 = vector.load %arg3[%c5_33, %c0_34, %c0_35] : memref<9x1x256xbf16, #tpu.memory_space<vmem>>, vector<1x1x256xbf16>
    %29 = vector.shape_cast %28 : vector<1x1x256xbf16> to vector<1x256xbf16>
    %c6_36 = arith.constant 6 : index
    %c0_37 = arith.constant 0 : index
    %c0_38 = arith.constant 0 : index
    %30 = vector.load %arg3[%c6_36, %c0_37, %c0_38] : memref<9x1x256xbf16, #tpu.memory_space<vmem>>, vector<1x1x256xbf16>
    %31 = vector.shape_cast %30 : vector<1x1x256xbf16> to vector<1x256xbf16>
    %c7_39 = arith.constant 7 : index
    %c0_40 = arith.constant 0 : index
    %c0_41 = arith.constant 0 : index
    %32 = vector.load %arg3[%c7_39, %c0_40, %c0_41] : memref<9x1x256xbf16, #tpu.memory_space<vmem>>, vector<1x1x256xbf16>
    %33 = vector.shape_cast %32 : vector<1x1x256xbf16> to vector<1x256xbf16>
    %c8_42 = arith.constant 8 : index
    %c0_43 = arith.constant 0 : index
    %c0_44 = arith.constant 0 : index
    %34 = vector.load %arg3[%c8_42, %c0_43, %c0_44] : memref<9x1x256xbf16, #tpu.memory_space<vmem>>, vector<1x1x256xbf16>
    %35 = vector.shape_cast %34 : vector<1x1x256xbf16> to vector<1x256xbf16>
    %cst = arith.constant 0.000000e+00 : f32
    %36 = vector.broadcast %cst : f32 to vector<8x1xf32>
    %cst_45 = arith.constant 0.000000e+00 : f32
    %37 = vector.broadcast %cst_45 : f32 to vector<8x1xf32>
    %c0_46 = arith.constant 0 : index
    %c0_47 = arith.constant 0 : index
    %c0_48 = arith.constant 0 : index
    %38 = vector.load %arg1[%c0_46, %c0_47, %c0_48] : memref<2x4x290xbf16, #tpu.memory_space<vmem>>, vector<1x4x290xbf16>
    %39 = vector.shape_cast %38 : vector<1x4x290xbf16> to vector<4x290xbf16>
    %cst_49 = arith.constant 0.000000e+00 : f32
    %40 = vector.broadcast %cst_49 : f32 to vector<8x256xf32>
    %41 = vector.extract_strided_slice %39 {offsets = [0, 0], sizes = [4, 256], strides = [1, 1]} : vector<4x290xbf16> to vector<4x256xbf16>
    %42 = vector.broadcast %19 : vector<1x256xbf16> to vector<4x256xbf16>
    %43 = arith.mulf %41, %42 : vector<4x256xbf16>
    %cst_50 = arith.constant dense<0.000000e+00> : vector<8x256xf32>
    %44 = tpu.matmul %1, %43, %cst_50 {dimension_numbers = #tpu.dot_dimension_numbers<[1], [0], [0], [1], [0, 0, 1, 1], [], []>} : vector<8x4xbf16>, vector<4x256xbf16>, vector<8x256xf32> -> vector<8x256xf32>
    %45 = arith.addf %40, %44 : vector<8x256xf32>
    %46 = vector.extract_strided_slice %39 {offsets = [0, 1], sizes = [4, 256], strides = [1, 1]} : vector<4x290xbf16> to vector<4x256xbf16>
    %47 = vector.broadcast %21 : vector<1x256xbf16> to vector<4x256xbf16>
    %48 = arith.mulf %46, %47 : vector<4x256xbf16>
    %cst_51 = arith.constant dense<0.000000e+00> : vector<8x256xf32>
    %49 = tpu.matmul %3, %48, %cst_51 {dimension_numbers = #tpu.dot_dimension_numbers<[1], [0], [0], [1], [0, 0, 1, 1], [], []>} : vector<8x4xbf16>, vector<4x256xbf16>, vector<8x256xf32> -> vector<8x256xf32>
    %50 = arith.addf %45, %49 : vector<8x256xf32>
    %51 = vector.extract_strided_slice %39 {offsets = [0, 2], sizes = [4, 256], strides = [1, 1]} : vector<4x290xbf16> to vector<4x256xbf16>
    %52 = vector.broadcast %23 : vector<1x256xbf16> to vector<4x256xbf16>
    %53 = arith.mulf %51, %52 : vector<4x256xbf16>
    %cst_52 = arith.constant dense<0.000000e+00> : vector<8x256xf32>
    %54 = tpu.matmul %5, %53, %cst_52 {dimension_numbers = #tpu.dot_dimension_numbers<[1], [0], [0], [1], [0, 0, 1, 1], [], []>} : vector<8x4xbf16>, vector<4x256xbf16>, vector<8x256xf32> -> vector<8x256xf32>
    %55 = arith.addf %50, %54 : vector<8x256xf32>
    %56 = vector.extract_strided_slice %39 {offsets = [0, 16], sizes = [4, 256], strides = [1, 1]} : vector<4x290xbf16> to vector<4x256xbf16>
    %57 = vector.broadcast %25 : vector<1x256xbf16> to vector<4x256xbf16>
    %58 = arith.mulf %56, %57 : vector<4x256xbf16>
    %cst_53 = arith.constant dense<0.000000e+00> : vector<8x256xf32>
    %59 = tpu.matmul %7, %58, %cst_53 {dimension_numbers = #tpu.dot_dimension_numbers<[1], [0], [0], [1], [0, 0, 1, 1], [], []>} : vector<8x4xbf16>, vector<4x256xbf16>, vector<8x256xf32> -> vector<8x256xf32>
    %60 = arith.addf %55, %59 : vector<8x256xf32>
    %61 = vector.extract_strided_slice %39 {offsets = [0, 17], sizes = [4, 256], strides = [1, 1]} : vector<4x290xbf16> to vector<4x256xbf16>
    %62 = vector.broadcast %27 : vector<1x256xbf16> to vector<4x256xbf16>
    %63 = arith.mulf %61, %62 : vector<4x256xbf16>
    %cst_54 = arith.constant dense<0.000000e+00> : vector<8x256xf32>
    %64 = tpu.matmul %9, %63, %cst_54 {dimension_numbers = #tpu.dot_dimension_numbers<[1], [0], [0], [1], [0, 0, 1, 1], [], []>} : vector<8x4xbf16>, vector<4x256xbf16>, vector<8x256xf32> -> vector<8x256xf32>
    %65 = arith.addf %60, %64 : vector<8x256xf32>
    %66 = vector.extract_strided_slice %39 {offsets = [0, 18], sizes = [4, 256], strides = [1, 1]} : vector<4x290xbf16> to vector<4x256xbf16>
    %67 = vector.broadcast %29 : vector<1x256xbf16> to vector<4x256xbf16>
    %68 = arith.mulf %66, %67 : vector<4x256xbf16>
    %cst_55 = arith.constant dense<0.000000e+00> : vector<8x256xf32>
    %69 = tpu.matmul %11, %68, %cst_55 {dimension_numbers = #tpu.dot_dimension_numbers<[1], [0], [0], [1], [0, 0, 1, 1], [], []>} : vector<8x4xbf16>, vector<4x256xbf16>, vector<8x256xf32> -> vector<8x256xf32>
    %70 = arith.addf %65, %69 : vector<8x256xf32>
    %71 = vector.extract_strided_slice %39 {offsets = [0, 32], sizes = [4, 256], strides = [1, 1]} : vector<4x290xbf16> to vector<4x256xbf16>
    %72 = vector.broadcast %31 : vector<1x256xbf16> to vector<4x256xbf16>
    %73 = arith.mulf %71, %72 : vector<4x256xbf16>
    %cst_56 = arith.constant dense<0.000000e+00> : vector<8x256xf32>
    %74 = tpu.matmul %13, %73, %cst_56 {dimension_numbers = #tpu.dot_dimension_numbers<[1], [0], [0], [1], [0, 0, 1, 1], [], []>} : vector<8x4xbf16>, vector<4x256xbf16>, vector<8x256xf32> -> vector<8x256xf32>
    %75 = arith.addf %70, %74 : vector<8x256xf32>
    %76 = vector.extract_strided_slice %39 {offsets = [0, 33], sizes = [4, 256], strides = [1, 1]} : vector<4x290xbf16> to vector<4x256xbf16>
    %77 = vector.broadcast %33 : vector<1x256xbf16> to vector<4x256xbf16>
    %78 = arith.mulf %76, %77 : vector<4x256xbf16>
    %cst_57 = arith.constant dense<0.000000e+00> : vector<8x256xf32>
    %79 = tpu.matmul %15, %78, %cst_57 {dimension_numbers = #tpu.dot_dimension_numbers<[1], [0], [0], [1], [0, 0, 1, 1], [], []>} : vector<8x4xbf16>, vector<4x256xbf16>, vector<8x256xf32> -> vector<8x256xf32>
    %80 = arith.addf %75, %79 : vector<8x256xf32>
    %81 = vector.extract_strided_slice %39 {offsets = [0, 34], sizes = [4, 256], strides = [1, 1]} : vector<4x290xbf16> to vector<4x256xbf16>
    %82 = vector.broadcast %35 : vector<1x256xbf16> to vector<4x256xbf16>
    %83 = arith.mulf %81, %82 : vector<4x256xbf16>
    %cst_58 = arith.constant dense<0.000000e+00> : vector<8x256xf32>
    %84 = tpu.matmul %17, %83, %cst_58 {dimension_numbers = #tpu.dot_dimension_numbers<[1], [0], [0], [1], [0, 0, 1, 1], [], []>} : vector<8x4xbf16>, vector<4x256xbf16>, vector<8x256xf32> -> vector<8x256xf32>
    %85 = arith.addf %80, %84 : vector<8x256xf32>
    %c0_59 = arith.constant 0 : index
    %c0_60 = arith.constant 0 : index
    %c0_61 = arith.constant 0 : index
    %86 = vector.load %arg4[%c0_59, %c0_60, %c0_61] : memref<2x8x256xf32, #tpu.memory_space<vmem>>, vector<1x8x256xf32>
    %87 = vector.shape_cast %86 : vector<1x8x256xf32> to vector<8x256xf32>
    %88 = vector.shape_cast %85 : vector<8x256xf32> to vector<1x8x256xf32>
    tpu.vector_store %arg4[%c0_59, %c0_60, %c0_61], %88 {strides = array<i32>} : memref<2x8x256xf32, #tpu.memory_space<vmem>>, vector<1x8x256xf32>,
    %cst_62 = arith.constant dense<0.000000e+00> : vector<8xf32>
    %89 = vector.multi_reduction <add>, %85, %cst_62 [1] : vector<8x256xf32> to vector<8xf32>
    %90 = vector.shape_cast %89 : vector<8xf32> to vector<8x1xf32>
    %91 = arith.addf %36, %90 : vector<8x1xf32>
    %92 = arith.mulf %85, %85 : vector<8x256xf32>
    %cst_63 = arith.constant dense<0.000000e+00> : vector<8xf32>
    %93 = vector.multi_reduction <add>, %92, %cst_63 [1] : vector<8x256xf32> to vector<8xf32>
    %94 = vector.shape_cast %93 : vector<8xf32> to vector<8x1xf32>
    %95 = arith.addf %37, %94 : vector<8x1xf32>
    %c1_64 = arith.constant 1 : index
    %c0_65 = arith.constant 0 : index
    %c0_66 = arith.constant 0 : index
    %96 = vector.load %arg1[%c1_64, %c0_65, %c0_66] : memref<2x4x290xbf16, #tpu.memory_space<vmem>>, vector<1x4x290xbf16>
    %97 = vector.shape_cast %96 : vector<1x4x290xbf16> to vector<4x290xbf16>
    %cst_67 = arith.constant 0.000000e+00 : f32
    %98 = vector.broadcast %cst_67 : f32 to vector<8x256xf32>
    %99 = vector.extract_strided_slice %97 {offsets = [0, 0], sizes = [4, 256], strides = [1, 1]} : vector<4x290xbf16> to vector<4x256xbf16>
    %100 = vector.broadcast %19 : vector<1x256xbf16> to vector<4x256xbf16>
    %101 = arith.mulf %99, %100 : vector<4x256xbf16>
    %cst_68 = arith.constant dense<0.000000e+00> : vector<8x256xf32>
    %102 = tpu.matmul %1, %101, %cst_68 {dimension_numbers = #tpu.dot_dimension_numbers<[1], [0], [0], [1], [0, 0, 1, 1], [], []>} : vector<8x4xbf16>, vector<4x256xbf16>, vector<8x256xf32> -> vector<8x256xf32>
    %103 = arith.addf %98, %102 : vector<8x256xf32>
    %104 = vector.extract_strided_slice %97 {offsets = [0, 1], sizes = [4, 256], strides = [1, 1]} : vector<4x290xbf16> to vector<4x256xbf16>
    %105 = vector.broadcast %21 : vector<1x256xbf16> to vector<4x256xbf16>
    %106 = arith.mulf %104, %105 : vector<4x256xbf16>
    %cst_69 = arith.constant dense<0.000000e+00> : vector<8x256xf32>
    %107 = tpu.matmul %3, %106, %cst_69 {dimension_numbers = #tpu.dot_dimension_numbers<[1], [0], [0], [1], [0, 0, 1, 1], [], []>} : vector<8x4xbf16>, vector<4x256xbf16>, vector<8x256xf32> -> vector<8x256xf32>
    %108 = arith.addf %103, %107 : vector<8x256xf32>
    %109 = vector.extract_strided_slice %97 {offsets = [0, 2], sizes = [4, 256], strides = [1, 1]} : vector<4x290xbf16> to vector<4x256xbf16>
    %110 = vector.broadcast %23 : vector<1x256xbf16> to vector<4x256xbf16>
    %111 = arith.mulf %109, %110 : vector<4x256xbf16>
    %cst_70 = arith.constant dense<0.000000e+00> : vector<8x256xf32>
    %112 = tpu.matmul %5, %111, %cst_70 {dimension_numbers = #tpu.dot_dimension_numbers<[1], [0], [0], [1], [0, 0, 1, 1], [], []>} : vector<8x4xbf16>, vector<4x256xbf16>, vector<8x256xf32> -> vector<8x256xf32>
    %113 = arith.addf %108, %112 : vector<8x256xf32>
    %114 = vector.extract_strided_slice %97 {offsets = [0, 16], sizes = [4, 256], strides = [1, 1]} : vector<4x290xbf16> to vector<4x256xbf16>
    %115 = vector.broadcast %25 : vector<1x256xbf16> to vector<4x256xbf16>
    %116 = arith.mulf %114, %115 : vector<4x256xbf16>
    %cst_71 = arith.constant dense<0.000000e+00> : vector<8x256xf32>
    %117 = tpu.matmul %7, %116, %cst_71 {dimension_numbers = #tpu.dot_dimension_numbers<[1], [0], [0], [1], [0, 0, 1, 1], [], []>} : vector<8x4xbf16>, vector<4x256xbf16>, vector<8x256xf32> -> vector<8x256xf32>
    %118 = arith.addf %113, %117 : vector<8x256xf32>
    %119 = vector.extract_strided_slice %97 {offsets = [0, 17], sizes = [4, 256], strides = [1, 1]} : vector<4x290xbf16> to vector<4x256xbf16>
    %120 = vector.broadcast %27 : vector<1x256xbf16> to vector<4x256xbf16>
    %121 = arith.mulf %119, %120 : vector<4x256xbf16>
    %cst_72 = arith.constant dense<0.000000e+00> : vector<8x256xf32>
    %122 = tpu.matmul %9, %121, %cst_72 {dimension_numbers = #tpu.dot_dimension_numbers<[1], [0], [0], [1], [0, 0, 1, 1], [], []>} : vector<8x4xbf16>, vector<4x256xbf16>, vector<8x256xf32> -> vector<8x256xf32>
    %123 = arith.addf %118, %122 : vector<8x256xf32>
    %124 = vector.extract_strided_slice %97 {offsets = [0, 18], sizes = [4, 256], strides = [1, 1]} : vector<4x290xbf16> to vector<4x256xbf16>
    %125 = vector.broadcast %29 : vector<1x256xbf16> to vector<4x256xbf16>
    %126 = arith.mulf %124, %125 : vector<4x256xbf16>
    %cst_73 = arith.constant dense<0.000000e+00> : vector<8x256xf32>
    %127 = tpu.matmul %11, %126, %cst_73 {dimension_numbers = #tpu.dot_dimension_numbers<[1], [0], [0], [1], [0, 0, 1, 1], [], []>} : vector<8x4xbf16>, vector<4x256xbf16>, vector<8x256xf32> -> vector<8x256xf32>
    %128 = arith.addf %123, %127 : vector<8x256xf32>
    %129 = vector.extract_strided_slice %97 {offsets = [0, 32], sizes = [4, 256], strides = [1, 1]} : vector<4x290xbf16> to vector<4x256xbf16>
    %130 = vector.broadcast %31 : vector<1x256xbf16> to vector<4x256xbf16>
    %131 = arith.mulf %129, %130 : vector<4x256xbf16>
    %cst_74 = arith.constant dense<0.000000e+00> : vector<8x256xf32>
    %132 = tpu.matmul %13, %131, %cst_74 {dimension_numbers = #tpu.dot_dimension_numbers<[1], [0], [0], [1], [0, 0, 1, 1], [], []>} : vector<8x4xbf16>, vector<4x256xbf16>, vector<8x256xf32> -> vector<8x256xf32>
    %133 = arith.addf %128, %132 : vector<8x256xf32>
    %134 = vector.extract_strided_slice %97 {offsets = [0, 33], sizes = [4, 256], strides = [1, 1]} : vector<4x290xbf16> to vector<4x256xbf16>
    %135 = vector.broadcast %33 : vector<1x256xbf16> to vector<4x256xbf16>
    %136 = arith.mulf %134, %135 : vector<4x256xbf16>
    %cst_75 = arith.constant dense<0.000000e+00> : vector<8x256xf32>
    %137 = tpu.matmul %15, %136, %cst_75 {dimension_numbers = #tpu.dot_dimension_numbers<[1], [0], [0], [1], [0, 0, 1, 1], [], []>} : vector<8x4xbf16>, vector<4x256xbf16>, vector<8x256xf32> -> vector<8x256xf32>
    %138 = arith.addf %133, %137 : vector<8x256xf32>
    %139 = vector.extract_strided_slice %97 {offsets = [0, 34], sizes = [4, 256], strides = [1, 1]} : vector<4x290xbf16> to vector<4x256xbf16>
    %140 = vector.broadcast %35 : vector<1x256xbf16> to vector<4x256xbf16>
    %141 = arith.mulf %139, %140 : vector<4x256xbf16>
    %cst_76 = arith.constant dense<0.000000e+00> : vector<8x256xf32>
    %142 = tpu.matmul %17, %141, %cst_76 {dimension_numbers = #tpu.dot_dimension_numbers<[1], [0], [0], [1], [0, 0, 1, 1], [], []>} : vector<8x4xbf16>, vector<4x256xbf16>, vector<8x256xf32> -> vector<8x256xf32>
    %143 = arith.addf %138, %142 : vector<8x256xf32>
    %c1_77 = arith.constant 1 : index
    %c0_78 = arith.constant 0 : index
    %c0_79 = arith.constant 0 : index
    %144 = vector.load %arg4[%c1_77, %c0_78, %c0_79] : memref<2x8x256xf32, #tpu.memory_space<vmem>>, vector<1x8x256xf32>
    %145 = vector.shape_cast %144 : vector<1x8x256xf32> to vector<8x256xf32>
    %146 = vector.shape_cast %143 : vector<8x256xf32> to vector<1x8x256xf32>
    tpu.vector_store %arg4[%c1_77, %c0_78, %c0_79], %146 {strides = array<i32>} : memref<2x8x256xf32, #tpu.memory_space<vmem>>, vector<1x8x256xf32>,
    %cst_80 = arith.constant dense<0.000000e+00> : vector<8xf32>
    %147 = vector.multi_reduction <add>, %143, %cst_80 [1] : vector<8x256xf32> to vector<8xf32>
    %148 = vector.shape_cast %147 : vector<8xf32> to vector<8x1xf32>
    %149 = arith.addf %91, %148 : vector<8x1xf32>
    %150 = arith.mulf %143, %143 : vector<8x256xf32>
    %cst_81 = arith.constant dense<0.000000e+00> : vector<8xf32>
    %151 = vector.multi_reduction <add>, %150, %cst_81 [1] : vector<8x256xf32> to vector<8xf32>
    %152 = vector.shape_cast %151 : vector<8xf32> to vector<8x1xf32>
    %153 = arith.addf %95, %152 : vector<8x1xf32>
    %154 = tpu.concatenate %149, %153 in 1 : vector<8x1xf32>, vector<8x1xf32> -> vector<8x2xf32>
    %c0_82 = arith.constant 0 : index
    %c0_83 = arith.constant 0 : index
    %c0_84 = arith.constant 0 : index
    %155 = vector.load %arg5[%c0_82, %c0_83, %c0_84] : memref<1x8x2xf32, #tpu.memory_space<vmem>>, vector<1x8x2xf32>
    %156 = vector.shape_cast %155 : vector<1x8x2xf32> to vector<8x2xf32>
    %157 = vector.shape_cast %154 : vector<8x2xf32> to vector<1x8x2xf32>
    tpu.vector_store %arg5[%c0_82, %c0_83, %c0_84], %157 {strides = array<i32>} : memref<1x8x2xf32, #tpu.memory_space<vmem>>, vector<1x8x2xf32>,
    return
  }
  func.func @transform_0(%arg0: i32) -> (i32, i32, i32) {
    %c0_i32 = arith.constant 0 : i32
    %c0_i32_0 = arith.constant 0 : i32
    %c0_i32_1 = arith.constant 0 : i32
    return %arg0, %c0_i32, %c0_i32_0 : i32, i32, i32
  }
  func.func @transform_1(%arg0: i32) -> (i32, i32, i32) {
    %c0_i32 = arith.constant 0 : i32
    %c0_i32_0 = arith.constant 0 : i32
    %c0_i32_1 = arith.constant 0 : i32
    %c0_i32_2 = arith.constant 0 : i32
    return %c0_i32, %c0_i32_0, %c0_i32_1 : i32, i32, i32
  }
  func.func @transform_2(%arg0: i32) -> (i32, i32, i32) {
    %c0_i32 = arith.constant 0 : i32
    %c0_i32_0 = arith.constant 0 : i32
    %c0_i32_1 = arith.constant 0 : i32
    %c0_i32_2 = arith.constant 0 : i32
    return %c0_i32, %c0_i32_0, %c0_i32_1 : i32, i32, i32
  }
  func.func @transform_3(%arg0: i32) -> (i32, i32, i32) {
    %c0_i32 = arith.constant 0 : i32
    %c0_i32_0 = arith.constant 0 : i32
    %c0_i32_1 = arith.constant 0 : i32
    return %arg0, %c0_i32, %c0_i32_0 : i32, i32, i32
  }
  func.func @transform_4(%arg0: i32) -> (i32, i32, i32) {
    %c0_i32 = arith.constant 0 : i32
    %c0_i32_0 = arith.constant 0 : i32
    %c0_i32_1 = arith.constant 0 : i32
    return %arg0, %c0_i32, %c0_i32_0 : i32, i32, i32
  }
}

</mosaic_0001>

<bundles_post_ra>
// kernel: tpu_custom_call.1
= control target key start
LH: loop header
LB: loop body
LE: loop exit
PB: predicated region body
PF: predicated region fallthrough
CT: control target
= control target key end

     0   :  { %v65_v1 = vlaneseq  ;;  %v2028_v2 = vmov 1966171168   ;;  %v2029_v5 = vmov 1983009808   ;;  %s2623_s0 = inlined_call_operand.vmem [shape: bf16[2,4,290], index: 0, kind: input, shape index: {}]   ;;  %s2624_s1 = inlined_call_operand.vmem [shape: bf16[9,8,4], index: 1, kind: input, shape index: {}]   ;;  %s2625_s2 = inlined_call_operand.vmem [shape: bf16[9,1,256], index: 2, kind: input, shape index: {}]   ;;  %s2626_s3 = inlined_call_operand.hbm [shape: f32[2,8,256], index: 3, kind: output, shape index: {0}]   ;;  %s2627_s4 = inlined_call_operand.vmem [shape: f32[1,8,2], index: 4, kind: output, shape index: {1}]  }
   0x1   :  { %v1940_v0 = vld.sshfl [vmem:[%s2625_s2 + $0x2] sm:$0x11 pattern:$0x75316420]  ;;  %v63_v3 = vunpack.c.l.s4 %v2028_v2  ;;  %v94_v6 = vunpack.c.l.s4 %v2029_v5 }
   0x2   :  { %v66_v4 = vshrl.u32 %v65_v1, 7  ;;  %v1948_v7 = vld.sshfl [vmem:[%s2625_s2 + $0x6] sm:$0x11 pattern:$0x75316420]  ;;  %v110_v9 = vcombine.high %v1940_v0, %v1940_v0 }
   0x3   :  { %v64_v8 = vunpack.c.0.s8 %v63_v3  ;;  %v433_v10 = vcombine.high %v1948_v7, %v1948_v7  ;;  %v1945_v11 = vld.sshfl [vmem:[%s2625_s2 + $0x4] sm:$0x11 pattern:$0x75316420]  ;;  %v95_v12 = vunpack.c.0.s8 %v94_v6 }
   0x4   :  { %v301_v13 = vcombine.high %v1945_v11, %v1945_v11  ;;  %v1951_v14 = vld.sshfl [vmem:[%s2625_s2 + $0x8] sm:$0x11 pattern:$0x75316420]  ;;  %v2091_v18 = vsub.s32 0, %v66_v4 }
   0x5   :  { %v2086_v15 = vsub.s32 %v64_v8, %v66_v4  ;;  %v565_v16 = vcombine.high %v1951_v14, %v1951_v14  ;;  %v1954_v17 = vld.sshfl [vmem:[%s2625_s2 + $0xa] sm:$0x11 pattern:$0x75316420]  ;;  %v2093_v19 = vsub.s32 %v95_v12, %v66_v4 }
   0x6   :  { %v697_v20 = vcombine.high %v1954_v17, %v1954_v17 }
   0x7   :  { %v117_v21 = vrot.slane %v1940_v0, %v2086_v15  ;;  %v124_v22 = vrot.slane %v110_v9, %v2086_v15  ;;  %v440_v23 = vrot.slane %v1948_v7, %v2086_v15  ;;  %v447_v24 = vrot.slane %v433_v10, %v2086_v15 }
   0x8   :  { %v308_v25 = vrot.slane %v1945_v11, %v2086_v15  ;;  %v315_v26 = vrot.slane %v301_v13, %v2086_v15  ;;  %v572_v27 = vrot.slane %v1951_v14, %v2086_v15  ;;  %v579_v28 = vrot.slane %v565_v16, %v2086_v15 }
   0x9   :  { %10 = vsyncpa [#allocation3], 0  ;;  %v126_v29 = vpack.i.b16 %v117_v21, %v117_v21  ;;  %v133_v30 = vpack.i.b16 %v124_v22, %v124_v22  ;;  %v449_v31 = vpack.i.b16 %v440_v23, %v440_v23  ;;  %v456_v32 = vpack.i.b16 %v447_v24, %v447_v24  ;;  %v1957_v41 = vld.sshfl [vmem:[%s2625_s2 + $0xc] sm:$0x11 pattern:$0x75316420] }
   0xa   :  { %v317_v33 = vpack.i.b16 %v308_v25, %v308_v25  ;;  %v324_v34 = vpack.i.b16 %v315_v26, %v315_v26  ;;  %v581_v35 = vpack.i.b16 %v572_v27, %v572_v27  ;;  %v588_v36 = vpack.i.b16 %v579_v28, %v579_v28  ;;  %v1960_v54 = vld.sshfl [vmem:[%s2625_s2 + $0xe] sm:$0x11 pattern:$0x75316420]  ;;  %s2030_s5 = smov 1   ;;  %s2031_s6 = smov 16  }
   0xb   :  { %v131_v37 = vrot.slane %v126_v29, %v2091_v18  ;;  %v138_v38 = vrot.slane %v133_v30, %v2091_v18  ;;  %v454_v39 = vrot.slane %v449_v31, %v2091_v18  ;;  %v461_v40 = vrot.slane %v456_v32, %v2091_v18  ;;  %v1963_v59 = vld.sshfl [vmem:[%s2625_s2 + $0x10] sm:$0x11 pattern:$0x75316420]  ;;  %s2032_s7 = smov 2   ;;  %s2033_s8 = smov 17  }
   0xc   :  { %v322_v42 = vrot.slane %v317_v33, %v2091_v18  ;;  %v329_v43 = vrot.slane %v324_v34, %v2091_v18  ;;  %v586_v44 = vrot.slane %v581_v35, %v2091_v18  ;;  %v593_v45 = vrot.slane %v588_v36, %v2091_v18  ;;  %s2034_s9 = smov 18   ;;  %s2035_s10 = smov 32   ;;  %v2148_v32 = vld [vmem:[%s2623_s0] sm:$0x3f] }
   0xd   :  { %v141_v46 = vcombine.low %v131_v37, %v138_v38  ;;  %v464_v47 = vcombine.low %v454_v39, %v461_v40  ;;  %v704_v48 = vrot.slane %v1954_v17, %v2086_v15  ;;  %v711_v49 = vrot.slane %v697_v20, %v2086_v15  ;;  %s2036_s11 = smov 33   ;;  %s2037_s12 = smov 34  }
   0xe   :  { %v332_v50 = vcombine.low %v322_v42, %v329_v43  ;;  %v596_v51 = vcombine.low %v586_v44, %v593_v45  ;;  %v829_v52 = vcombine.high %v1957_v41, %v1957_v41  ;;  %v836_v53 = vrot.slane %v1957_v41, %v2086_v15  ;;  %s2038_s15 = smov 127   ;;  %s2039_s16 = smov 112  }
   0xf   :  { %v148_v55 = vrot.slane %v141_v46, %v2093_v19  ;;  %v471_v56 = vrot.slane %v464_v47, %v2093_v19  ;;  %v713_v57 = vpack.i.b16 %v704_v48, %v704_v48  ;;  %v720_v58 = vpack.i.b16 %v711_v49, %v711_v49  ;;  %s2040_s17 = smov 126   ;;  %s2041_s20 = smov 111  }
  0x10   :  { %v339_v60 = vrot.slane %v332_v50, %v2093_v19  ;;  %v603_v61 = vrot.slane %v596_v51, %v2093_v19  ;;  %v843_v62 = vrot.slane %v829_v52, %v2086_v15  ;;  %v845_v63 = vpack.i.b16 %v836_v53, %v836_v53  ;;  %s2042_s21 = smov 110   ;;  %s2044_s22 = smov 95  }
  0x11   :  { %149 = vrot.lane.b32.xlu0 %v148_v55, %s2030_s5  ;;  %472 = vrot.lane.b32.xlu1 %v471_v56, %s2031_s6  ;;  %v718_v0 = vrot.slane %v713_v57, %v2091_v18  ;;  %v725_v1 = vrot.slane %v720_v58, %v2091_v18  ;;  %v961_v2 = vcombine.high %v1960_v54, %v1960_v54  ;;  %vm152_vm0 = vcmask 7168   ;;  %s2045_s23 = smov 94  }
  0x12   :  { %v850_v3 = vrot.slane %v845_v63, %v2091_v18  ;;  %v852_v4 = vpack.i.b16 %v843_v62, %v843_v62  ;;  %v968_v5 = vrot.slane %v1960_v54, %v2086_v15  ;;  %v1093_v6 = vcombine.high %v1963_v59, %v1963_v59 }
  0x13   :  { %v728_v7 = vcombine.low %v718_v0, %v725_v1  ;;  %v975_v8 = vrot.slane %v961_v2, %v2086_v15  ;;  %v1100_v9 = vrot.slane %v1963_v59, %v2086_v15  ;;  %vm475_vm1 = vcmask 130048   ;;  %v2201_v1 = vld [vmem:[%s2623_s0 + $0x6] sm:$0x3f]  ;;  %s2043_s0 = smov 96  }
  0x14   :  { %v857_v10 = vrot.slane %v852_v4, %v2091_v18  ;;  %v977_v11 = vpack.i.b16 %v968_v5, %v968_v5  ;;  %v1107_v12 = vrot.slane %v1093_v6, %v2086_v15  ;;  %vm343_vm2 = vcmask 15360  }
  0x15   :  { %340 = vrot.lane.b32.xlu0 %v339_v60, %s2032_s7  ;;  %604 = vrot.lane.b32.xlu1 %v603_v61, %s2033_s8  ;;  %v735_v13 = vrot.slane %v728_v7, %v2093_v19  ;;  %v984_v14 = vpack.i.b16 %v975_v8, %v975_v8  ;;  %v1109_v16 = vpack.i.b16 %v1100_v9, %v1100_v9  ;;  %vm607_vm3 = vcmask 138240  }
  0x16   :  { %v860_v17 = vcombine.low %v850_v3, %v857_v10  ;;  %v982_v20 = vrot.slane %v977_v11, %v2091_v18  ;;  %v1116_v21 = vpack.i.b16 %v1107_v12, %v1107_v12  ;;  %vm739_vm4 = vcmask 146432   ;;  %v1939_v12 = vld.sshfl [vmem:[%s2625_s2] sm:$0x11 pattern:$0x75316420] }
  0x17   :  { %v989_v22 = vrot.slane %v984_v14, %v2091_v18  ;;  %v1114_v23 = vrot.slane %v1109_v16, %v2091_v18  ;;  %vm871_vm5 = vcmask 261120   ;;  %vm1003_vm6 = vcmask 269312  }
  0x18   :  { %v867_v24 = vrot.slane %v860_v17, %v2093_v19  ;;  %v1121_v25 = vrot.slane %v1116_v21, %v2091_v18  ;;  %vm1135_vm7 = vcmask 277504   ;;  %v68_v21 = vrot.slane %v1939_v12, %v2086_v15 }
  0x19   :  { %736 = vrot.lane.b32.xlu0 %v735_v13, %s2034_s9  ;;  %v992_v26 = vcombine.low %v982_v20, %v989_v22  ;;  %v61_v20 = vcombine.high %v1939_v12, %v1939_v12  ;;  %v2046_v22 = vmov 0   ;;  %vm186_vm8 = vcmask 1041408  }
  0x1a   :  { %868 = vrot.lane.b32.xlu1 %v867_v24, %s2035_s10  ;;  %v1124_v27 = vcombine.low %v1114_v23, %v1121_v25  ;;  %225 = vmatprep.mubr.bf16.mxu0 %v2046_v22  ;;  %vm182_vm9 = vcmask 31744   ;;  %vm179_vm10 = vcmask 1039360   ;;  %vm370_vm11 = vcmask 1031168  }
  0x1b   :  { %v999_v28 = vrot.slane %v992_v26, %v2093_v19  ;;  %v75_v23 = vrot.slane %v61_v20, %v2086_v15  ;;  %284 = vmatprep.mubr.bf16.mxu1 %v2046_v22  ;;  %vm502_vm12 = vcmask 916480   ;;  %vm634_vm13 = vcmask 908288  }
  0x1c   :  { %v1131_v29 = vrot.slane %v1124_v27, %v2093_v19  ;;  %v77_v27 = vpack.i.b16 %v68_v21, %v68_v21  ;;  %vm766_vm14 = vcmask 900096   ;;  %vm898_vm15 = vcmask 785408  }
  0x1d   :  { %1000 = vrot.lane.b32.xlu0 %v999_v28, %s2036_s11  ;;  %v84_v28 = vpack.i.b16 %v75_v23, %v75_v23 }
  0x1e   :  { %1132 = vrot.lane.b32.xlu1 %v1131_v29, %s2037_s12  ;;  %v82_v15 = vrot.slane %v77_v27, %v2091_v18 }
  0x1f   :  { %v89_v29 = vrot.slane %v84_v28, %v2091_v18 }
  0x83   :  { %v150_v30 = vpop.permute.xlu0 %149  ;;  %v473_v31 = vpop.permute.xlu1 %472 }
  0x84   :  { %v151_v33 = vrot.slane %v150_v30, 6  ;;  %v474_v34 = vrot.slane %v473_v31, 6 }
  0x86   :  { %v153_v35 = vsel %vm152_vm0, %v151_v33, %v150_v30  ;;  %v476_v37 = vsel %vm475_vm1, %v474_v34, %v473_v31  ;;  %v92_v34 = vcombine.low %v82_v15, %v89_v29  ;;  %vm1030_vm1 = vcmask 777216  }
  0x87   :  { %v2152_v36 = vmul.bf16 %v153_v35, %v2148_v32  ;;  %v341_v38 = vpop.permute.xlu0 %340  ;;  %v605_v39 = vpop.permute.xlu1 %604  ;;  %v2155_v42 = vmul.bf16 %v476_v37, %v2148_v32  ;;  %v2214_v4 = vmul.bf16 %v2201_v1, %v153_v35  ;;  %v2233_v8 = vmul.bf16 %v2201_v1, %v476_v37 }
  0x88   :  { %v342_v40 = vrot.slane %v341_v38, 6  ;;  %v606_v41 = vrot.slane %v605_v39, 6  ;;  %v2300_v35 = vrot.slane %v92_v34, %v2093_v19 }
  0x89   :  { %v2160_v45 = vrot.slane %v2152_v36, %v2093_v19  ;;  %v2172_v53 = vrot.slane %v2155_v42, %v2093_v19  ;;  %v2244_v11 = vrot.slane %v2214_v4, %v2093_v19  ;;  %v157_v13 = vcombine.high %v2152_v36, %v2152_v36 }
  0x8a   :  { %v344_v43 = vsel %vm343_vm2, %v342_v40, %v341_v38  ;;  %v608_v44 = vsel %vm607_vm3, %v606_v41, %v605_v39  ;;  %v2264_v17 = vrot.slane %v2233_v8, %v2093_v19  ;;  %v480_v18 = vcombine.high %v2155_v42, %v2155_v42 }
  0x8b   :  { %v2163_v46 = vmul.bf16 %v344_v43, %v2148_v32  ;;  %v737_v47 = vpop.permute.xlu0 %736  ;;  %173 = vrot.lane.b32.xlu0 %v2160_v45, %s2038_s15  ;;  %v2168_v50 = vmul.bf16 %v608_v44, %v2148_v32  ;;  %v2236_v9 = vmul.bf16 %v2201_v1, %v344_v43  ;;  %v2256_v14 = vmul.bf16 %v2201_v1, %v608_v44 }
  0x8c   :  { %v738_v48 = vrot.slane %v737_v47, 6  ;;  %v869_v49 = vpop.permute.xlu1 %868  ;;  %v171_v26 = vrot.slane %v157_v13, %v2093_v19  ;;  %v172_v31 = vcombine.high %v2160_v45, %v2160_v45  ;;  %v101_v39 = vmul.bf16 %v2300_v35, %v2148_v32 }
  0x8d   :  { %v870_v52 = vrot.slane %v869_v49, 6  ;;  %v2176_v54 = vrot.slane %v2163_v46, %v2093_v19  ;;  %v2187_v60 = vrot.slane %v2168_v50, %v2093_v19  ;;  %v2260_v16 = vrot.slane %v2236_v9, %v2093_v19 }
  0x8e   :  { %v740_v51 = vsel %vm739_vm4, %v738_v48, %v737_v47  ;;  %v2279_v25 = vrot.slane %v2256_v14, %v2093_v19  ;;  %v348_v36 = vcombine.high %v2163_v46, %v2163_v46  ;;  %v1231_v40 = vmul.bf16 %v2201_v1, %v2300_v35 }
  0x8f   :  { %v2179_v55 = vmul.bf16 %v740_v51, %v2148_v32  ;;  %v1001_v56 = vpop.permute.xlu0 %1000  ;;  %v872_v57 = vsel %vm871_vm5, %v870_v52, %v869_v49  ;;  %496 = vrot.lane.b32.xlu0 %v2172_v53, %s2039_s16  ;;  %364 = vrot.lane.b32.xlu1 %v2176_v54, %s2040_s17  ;;  %v2275_v24 = vmul.bf16 %v2201_v1, %v740_v51  ;;  %v2337_v49 = vld [vmem:[%s2624_s1] sm:$0xf]  ;;  %vm1162_vm3 = vcmask 769024  }
  0x90   :  { %v1002_v58 = vrot.slane %v1001_v56, 6  ;;  %v1133_v59 = vpop.permute.xlu1 %1132  ;;  %v2190_v61 = vmul.bf16 %v872_v57, %v2148_v32  ;;  %v2288_v30 = vmul.bf16 %v2201_v1, %v872_v57  ;;  %v363_v38 = vcombine.high %v2176_v54, %v2176_v54 }
  0x91   :  { %v1134_v63 = vrot.slane %v1133_v59, 6  ;;  %v2196_v0 = vrot.slane %v2179_v55, %v2093_v19  ;;  %v2294_v33 = vrot.slane %v2275_v24, %v2093_v19  ;;  %v241_v41 = vrot.slane %v101_v39, %v2093_v19 }
  0x92   :  { %v2192_v62 = vsel %vm1003_vm6, %v1002_v58, %v1001_v56  ;;  %v2222_v6 = vrot.slane %v2190_v61, %v2093_v19  ;;  %v2308_v37 = vrot.slane %v2288_v30, %v2093_v19  ;;  %v362_v42 = vrot.slane %v348_v36, %v2093_v19 }
  0x93   :  { %v2205_v2 = vmul.bf16 %v2192_v62, %v2148_v32  ;;  %v2207_v3 = vsel %vm1135_vm7, %v1134_v63, %v1133_v59  ;;  %628 = vrot.lane.b32.xlu1 %v2187_v60, %s2041_s20  ;;  %760 = vrot.lane.b32.xlu0 %v2196_v0, %s2042_s21  ;;  %v494_v43 = vrot.slane %v480_v18, %v2093_v19  ;;  %v247_v45 = vsel %vm186_vm8, %v241_v41, 0 }
  0x94   :  { %v2218_v5 = vmul.bf16 %v2207_v3, %v2148_v32  ;;  %v242_v44 = vcombine.high %v241_v41, %v241_v41  ;;  %v612_v32 = vcombine.high %v2168_v50, %v2168_v50  ;;  %v744_v46 = vcombine.high %v2179_v55, %v2179_v55 }
  0x95   :  { %v2226_v7 = vrot.slane %v2205_v2, %v2093_v19  ;;  %v495_v47 = vcombine.high %v2172_v53, %v2172_v53  ;;  %v627_v48 = vcombine.high %v2187_v60, %v2187_v60  ;;  %v876_v52 = vcombine.high %v2190_v61, %v2190_v61 }
  0x96   :  { %v2240_v10 = vrot.slane %v2218_v5, %v2093_v19  ;;  %1943 = vmatprep.subr.msk.bf16.mxu1 %vm186_vm8, %v242_v44  ;;  %v626_v50 = vrot.slane %v612_v32, %v2093_v19  ;;  %v758_v51 = vrot.slane %v744_v46, %v2093_v19  ;;  %v1008_v53 = vcombine.high %v2205_v2, %v2205_v2 }
  0x97   :  { %892 = vrot.lane.b32.xlu1 %v2222_v6, %s2043_s0  ;;  %1024 = vrot.lane.b32.xlu0 %v2226_v7, %s2044_s22  ;;  %v759_v54 = vcombine.high %v2196_v0, %v2196_v0  ;;  %v891_v55 = vcombine.high %v2222_v6, %v2222_v6  ;;  %v890_v56 = vrot.slane %v876_v52, %v2093_v19 }
  0x98   :  { %267 = vmatpush1.bf16.msra.mxu1 %v247_v45  ;;  %v1022_v57 = vrot.slane %v1008_v53, %v2093_v19  ;;  %v1234_v58 = vcombine.high %v2214_v4, %v2214_v4  ;;  %v1140_v59 = vcombine.high %v2218_v5, %v2218_v5  ;;  %v1023_v60 = vcombine.high %v2226_v7, %v2226_v7 }
  0x99   :  { %v1155_v61 = vcombine.high %v2240_v10, %v2240_v10  ;;  %v1736_v63 = vmul.bf16 %v2201_v1, %v2192_v62  ;;  %v1811_v4 = vmul.bf16 %v2201_v1, %v2207_v3  ;;  %v1249_v5 = vcombine.high %v2244_v11, %v2244_v11 }
  0x9a   :  { %v1154_v0 = vrot.slane %v1140_v59, %v2093_v19  ;;  %v1248_v2 = vrot.slane %v1234_v58, %v2093_v19  ;;  %v1438_v62 = vcombine.high %v2233_v8, %v2233_v8  ;;  %v1363_v7 = vcombine.high %v2236_v9, %v2236_v9  ;;  %v2463_v58 = vld [vmem:[%s2624_s1 + $0x8] sm:$0xf] }
  0x9b   :  { %1156 = vrot.lane.b32.xlu1 %v2240_v10, %s2045_s23  ;;  %1250 = vrot.lane.b32.xlu0 %v2244_v11, %s2038_s15  ;;  %v1745_v6 = vrot.slane %v1736_v63, %v2093_v19  ;;  %v1820_v10 = vrot.slane %v1811_v4, %v2093_v19  ;;  %v1378_v3 = vcombine.high %v2260_v16, %v2260_v16 }
  0x9c   :  { %1944 = vmatmul.mubr.msk.bf16.vlgmr.msra.gmra.mxu1 %vm182_vm9, %v2337_v49  ;;  %v1377_v11 = vrot.slane %v1363_v7, %v2093_v19  ;;  %v1452_v12 = vrot.slane %v1438_v62, %v2093_v19  ;;  %v1513_v8 = vcombine.high %v2256_v14, %v2256_v14  ;;  %v1588_v9 = vcombine.high %v2275_v24, %v2275_v24 }
  0x9d   :  { %546 = vmatprep.mubr.bf16.mxu1 %v2046_v22  ;;  %v1453_v13 = vcombine.high %v2264_v17, %v2264_v17  ;;  %v1663_v14 = vcombine.high %v2288_v30, %v2288_v30  ;;  %v1738_v23 = vcombine.high %v1736_v63, %v1736_v63  ;;  %v1678_v24 = vcombine.high %v2308_v37, %v2308_v37 }
  0x9e   :  { %v1527_v20 = vrot.slane %v1513_v8, %v2093_v19  ;;  %v1602_v21 = vrot.slane %v1588_v9, %v2093_v19  ;;  %v1813_v27 = vcombine.high %v1811_v4, %v1811_v4  ;;  %v1753_v28 = vcombine.high %v1745_v6, %v1745_v6  ;;  %v2475_v4 = vld [vmem:[%s2624_s1 + $0xc] sm:$0xf] }
  0x9f   :  { %1379 = vrot.lane.b32.xlu1 %v2260_v16, %s2040_s17  ;;  %1454 = vrot.lane.b32.xlu0 %v2264_v17, %s2039_s16  ;;  %v1528_v16 = vcombine.high %v2279_v25, %v2279_v25  ;;  %v1603_v17 = vcombine.high %v2294_v33, %v2294_v33  ;;  %v1828_v15 = vcombine.high %v1820_v10, %v1820_v10 }
  0xa0   :  { %v1827_v29 = vrot.slane %v1813_v27, %v2093_v19 }
  0xa3   :  { %1529 = vrot.lane.b32.xlu1 %v2279_v25, %s2041_s20  ;;  %177 = vrot.lane.b32.xlu0 %v171_v26, %s2038_s15  ;;  %v1677_v25 = vrot.slane %v1663_v14, %v2093_v19  ;;  %v1752_v26 = vrot.slane %v1738_v23, %v2093_v19 }
  0xa7   :  { %175 = vrot.lane.b32.xlu1 %v172_v31, %s2038_s15  ;;  %1604 = vrot.lane.b32.xlu0 %v2294_v33, %s2042_s21 }
  0xab   :  { %1679 = vrot.lane.b32.xlu1 %v2308_v37, %s2043_s0  ;;  %366 = vrot.lane.b32.xlu0 %v363_v38, %s2040_s17 }
  0xaf   :  { %368 = vrot.lane.b32.xlu1 %v362_v42, %s2040_s17  ;;  %500 = vrot.lane.b32.xlu0 %v494_v43, %s2039_s16 }
  0xb3   :  { %498 = vrot.lane.b32.xlu1 %v495_v47, %s2039_s16  ;;  %630 = vrot.lane.b32.xlu0 %v627_v48, %s2041_s20 }
  0xb7   :  { %632 = vrot.lane.b32.xlu1 %v626_v50, %s2041_s20  ;;  %764 = vrot.lane.b32.xlu0 %v758_v51, %s2042_s21  ;;  %v2449_v50 = vld [vmem:[%s2624_s1 + $0x4] sm:$0xf] }
  0xbb   :  { %762 = vrot.lane.b32.xlu1 %v759_v54, %s2042_s21  ;;  %894 = vrot.lane.b32.xlu0 %v891_v55, %s2043_s0 }
  0xbf   :  { %896 = vrot.lane.b32.xlu1 %v890_v56, %s2043_s0  ;;  %1028 = vrot.lane.b32.xlu0 %v1022_v57, %s2044_s22 }
  0xc3   :  { %1026 = vrot.lane.b32.xlu1 %v1023_v60, %s2044_s22  ;;  %1158 = vrot.lane.b32.xlu0 %v1155_v61, %s2045_s23 }
  0xc7   :  { %1160 = vrot.lane.b32.xlu1 %v1154_v0, %s2045_s23  ;;  %1254 = vrot.lane.b32.xlu0 %v1248_v2, %s2038_s15 }
  0xcb   :  { %1252 = vrot.lane.b32.xlu1 %v1249_v5, %s2038_s15  ;;  %1754 = vrot.lane.b32.xlu0 %v1745_v6, %s2044_s22 }
  0xcf   :  { %1829 = vrot.lane.b32.xlu1 %v1820_v10, %s2045_s23  ;;  %1381 = vrot.lane.b32.xlu0 %v1378_v3, %s2040_s17  ;;  %v2486_v10 = vld [vmem:[%s2624_s1 + $0x10] sm:$0xf] }
  0xd3   :  { %1383 = vrot.lane.b32.xlu1 %v1377_v11, %s2040_s17  ;;  %1458 = vrot.lane.b32.xlu0 %v1452_v12, %s2039_s16 }
  0xd7   :  { %1456 = vrot.lane.b32.xlu1 %v1453_v13, %s2039_s16  ;;  %1531 = vrot.lane.b32.xlu0 %v1528_v16, %s2041_s20  ;;  %v2499_v16 = vld [vmem:[%s2624_s1 + $0x14] sm:$0xf] }
  0xdb   :  { %1533 = vrot.lane.b32.xlu1 %v1527_v20, %s2041_s20  ;;  %1608 = vrot.lane.b32.xlu0 %v1602_v21, %s2042_s21 }
  0xdf   :  { %1606 = vrot.lane.b32.xlu1 %v1603_v17, %s2042_s21  ;;  %1681 = vrot.lane.b32.xlu0 %v1678_v24, %s2043_s0  ;;  %v2510_v17 = vld [vmem:[%s2624_s1 + $0x18] sm:$0xf] }
  0xe3   :  { %1683 = vrot.lane.b32.xlu1 %v1677_v25, %s2043_s0  ;;  %1758 = vrot.lane.b32.xlu0 %v1752_v26, %s2044_s22  ;;  %v1312_v26 = vrot.slane %v1231_v40, %v2093_v19  ;;  %v2529_v19 = vld [vmem:[%s2624_s1 + $0x1c] sm:$0xf] }
  0xe5   :  { %v1313_v40 = vcombine.high %v1312_v26, %v1312_v26 }
  0xe7   :  { %1756 = vrot.lane.b32.xlu1 %v1753_v28, %s2044_s22  ;;  %1831 = vrot.lane.b32.xlu0 %v1828_v15, %s2045_s23 }
  0xeb   :  { %1833 = vrot.lane.b32.xlu1 %v1827_v29, %s2045_s23 }
  0xfd   :  { %v174_v30 = vpop.permute.xlu0 %173 }
 0x101   :  { %v365_v31 = vpop.permute.xlu1 %364  ;;  %v497_v33 = vpop.permute.xlu0 %496 }
 0x105   :  { %v629_v34 = vpop.permute.xlu1 %628  ;;  %v761_v18 = vpop.permute.xlu0 %760 }
 0x109   :  { %v893_v36 = vpop.permute.xlu1 %892  ;;  %v2428_v37 = vpop.permute.xlu0 %1024 }
 0x10d   :  { %v2430_v38 = vpop.permute.xlu1 %1156  ;;  %v2432_v39 = vpop.permute.xlu0 %1250 }
 0x111   :  { %v2434_v41 = vpop.permute.xlu1 %1379  ;;  %v2436_v42 = vpop.permute.xlu0 %1454 }
 0x115   :  { %v2438_v43 = vpop.permute.xlu1 %1529  ;;  %v178_v44 = vpop.permute.xlu0 %177 }
 0x119   :  { %v176_v45 = vpop.permute.xlu1 %175  ;;  %v2440_v32 = vpop.permute.xlu0 %1604 }
 0x11a   :  { %v181_v46 = vsel %vm179_vm10, %v176_v45, %v178_v44  ;;  %v180_v47 = vsel %vm179_vm10, %v174_v30, %v176_v45 }
 0x11b   :  { %1941 = vmatprep.subr.msk.bf16.mxu0 %vm186_vm8, %v181_v46  ;;  %v188_v48 = vsel %vm186_vm8, %v180_v47, 0 }
 0x11c   :  { %208 = vmatpush1.bf16.msra.mxu0 %v188_v48 }
 0x11d   :  { %v2451_v51 = vpop.permute.xlu1 %1679  ;;  %v367_v52 = vpop.permute.xlu0 %366 }
 0x11e   :  { %v371_v53 = vsel %vm370_vm11, %v365_v31, %v367_v52 }
 0x11f   :  { %1942 = vmatmul.mubr.msk.bf16.vlgmr.msra.gmra.mxu0 %vm182_vm9, %v2449_v50  ;;  %v377_v57 = vsel %vm186_vm8, %v371_v53, 0 }
 0x120   :  { %414 = vmatprep.mubr.bf16.mxu0 %v2046_v22 }
 0x121   :  { %v369_v54 = vpop.permute.xlu1 %368  ;;  %v501_v55 = vpop.permute.xlu0 %500 }
 0x122   :  { %v372_v56 = vsel %vm370_vm11, %v367_v52, %v369_v54 }
 0x123   :  { %1946 = vmatprep.subr.msk.bf16.mxu0 %vm186_vm8, %v372_v56 }
 0x124   :  { %397 = vmatpush1.bf16.msra.mxu0 %v377_v57 }
 0x125   :  { %v499_v59 = vpop.permute.xlu1 %498  ;;  %v631_v60 = vpop.permute.xlu0 %630 }
 0x126   :  { %v503_v61 = vsel %vm502_vm12, %v497_v33, %v499_v59  ;;  %v504_v63 = vsel %vm502_vm12, %v499_v59, %v501_v55  ;;  %v635_v2 = vsel %vm634_vm13, %v629_v34, %v631_v60  ;;  %v2540_v33 = vld [vmem:[%s2624_s1 + $0x20] sm:$0xf]  ;;  %s2047_s1 = smov [#allocation2]  }
 0x127   :  { %v509_v0 = vsel %vm186_vm8, %v503_v61, 0  ;;  %1947 = vmatmul.mubr.msk.bf16.vlgmr.msra.gmra.mxu0 %vm182_vm9, %v2463_v58  ;;  %1949 = vmatprep.subr.msk.bf16.mxu1 %vm186_vm8, %v504_v63  ;;  %v641_v7 = vsel %vm186_vm8, %v635_v2, 0  ;;  %s1908_s18 = sshll.u32 %s2047_s1, 4  ;;  %s1909_s18 = int_to_ptr.vmem [resolvable:$true] %s1908_s18 }
 0x128   :  { %529 = vmatpush1.bf16.msra.mxu1 %v509_v0  ;;  %678 = vmatprep.mubr.bf16.mxu0 %v2046_v22  ;;  %s2006_s19 = scalar_lea.vmem %s1909_s18, 512  ;;  %p2011_p1 = scmp.lt.s32.totalorder %s1909_s18, %s1909_s18 }
 0x129   :  { %v633_v5 = vpop.permute.xlu1 %632  ;;  %v765_v6 = vpop.permute.xlu0 %764  ;;  %p2007_p0 = scmp.ne.s32.totalorder %s1909_s18, %s2006_s19  ;;  %p2012_p2 = scmp.lt.s32.totalorder %s2006_s19, %s2006_s19 }
 0x12a   :  { %v636_v62 = vsel %vm634_vm13, %v631_v60, %v633_v5 }
 0x12b   :  { %1950 = vmatmul.mubr.msk.bf16.vlgmr.msra.gmra.mxu1 %vm182_vm9, %v2475_v4  ;;  %1952 = vmatprep.subr.msk.bf16.mxu0 %vm186_vm8, %v636_v62  ;;  %p2013_p3 = por %p2012_p2, %p2011_p1 }
 0x12c   :  { %661 = vmatpush1.bf16.msra.mxu0 %v641_v7  ;;  %810 = vmatprep.mubr.bf16.mxu1 %v2046_v22 }
 0x12d   :  { %v763_v3 = vpop.permute.xlu1 %762  ;;  %v895_v11 = vpop.permute.xlu0 %894  ;;  %p2014_p4 = pnand %p2013_p3, %p2007_p0 }
 0x12e   :  { %v767_v12 = vsel %vm766_vm14, %v761_v18, %v763_v3  ;;  %v768_v8 = vsel %vm766_vm14, %v763_v3, %v765_v6  ;;  %v899_v13 = vsel %vm898_vm15, %v893_v36, %v895_v11  ;;  %v1315_v36 = vsel %vm186_vm8, %v1312_v26, 0 }
 0x12f   :  { %v773_v9 = vsel %vm186_vm8, %v767_v12, 0  ;;  %1953 = vmatmul.mubr.msk.bf16.vlgmr.msra.gmra.mxu0 %vm182_vm9, %v2486_v10  ;;  %1955 = vmatprep.subr.msk.bf16.mxu1 %vm186_vm8, %v768_v8  ;;  %v905_v23 = vsel %vm186_vm8, %v899_v13, 0 }
 0x130   :  { %793 = vmatpush1.bf16.msra.mxu1 %v773_v9  ;;  %942 = vmatprep.mubr.bf16.mxu0 %v2046_v22 }
 0x131   :  { %v897_v20 = vpop.permute.xlu1 %896  ;;  %v1029_v21 = vpop.permute.xlu0 %1028 }
 0x132   :  { %v900_v14 = vsel %vm898_vm15, %v895_v11, %v897_v20 }
 0x133   :  { %1956 = vmatmul.mubr.msk.bf16.vlgmr.msra.gmra.mxu1 %vm182_vm9, %v2499_v16  ;;  %1958 = vmatprep.subr.msk.bf16.mxu0 %vm186_vm8, %v900_v14 }
 0x134   :  { %925 = vmatpush1.bf16.msra.mxu0 %v905_v23  ;;  %1074 = vmatprep.mubr.bf16.mxu1 %v2046_v22 }
 0x135   :  { %v1027_v24 = vpop.permute.xlu1 %1026  ;;  %v1159_v25 = vpop.permute.xlu0 %1158 }
 0x136   :  { %v1031_v27 = vsel %vm1030_vm1, %v2428_v37, %v1027_v24  ;;  %v1032_v28 = vsel %vm1030_vm1, %v1027_v24, %v1029_v21  ;;  %v1163_v29 = vsel %vm1162_vm3, %v2430_v38, %v1159_v25 }
 0x137   :  { %v1037_v15 = vsel %vm186_vm8, %v1031_v27, 0  ;;  %1959 = vmatmul.mubr.msk.bf16.vlgmr.msra.gmra.mxu0 %vm182_vm9, %v2510_v17  ;;  %1961 = vmatprep.subr.msk.bf16.mxu1 %vm186_vm8, %v1032_v28  ;;  %v1169_v31 = vsel %vm186_vm8, %v1163_v29, 0 }
 0x138   :  { %1057 = vmatpush1.bf16.msra.mxu1 %v1037_v15  ;;  %1206 = vmatprep.mubr.bf16.mxu0 %v2046_v22 }
 0x139   :  { %v1161_v1 = vpop.permute.xlu1 %1160  ;;  %v1255_v35 = vpop.permute.xlu0 %1254 }
 0x13a   :  { %v1164_v30 = vsel %vm1162_vm3, %v1159_v25, %v1161_v1 }
 0x13b   :  { %1962 = vmatmul.mubr.msk.bf16.vlgmr.msra.gmra.mxu1 %vm182_vm9, %v2529_v19  ;;  %1964 = vmatprep.subr.msk.bf16.mxu0 %vm186_vm8, %v1164_v30 }
 0x13c   :  { %1189 = vmatpush1.bf16.msra.mxu0 %v1169_v31  ;;  %1296 = vmatprep.mubr.bf16.mxu1 %v2046_v22 }
 0x13d   :  { %v1253_v34 = vpop.permute.xlu1 %1252  ;;  %v2543_v18 = vpop.permute.xlu0 %1754  ;;  %1969 = vmatprep.subr.msk.bf16.mxu0 %vm186_vm8, %v1313_v40 }
 0x13e   :  { %v1256_v37 = vsel %vm179_vm10, %v2432_v39, %v1253_v34  ;;  %v1257_v38 = vsel %vm179_vm10, %v1253_v34, %v1255_v35 }
 0x13f   :  { %v1259_v44 = vsel %vm186_vm8, %v1256_v37, 0  ;;  %1965 = vmatmul.mubr.msk.bf16.vlgmr.msra.gmra.mxu0 %vm182_vm9, %v2540_v33  ;;  %1967 = vmatprep.subr.msk.bf16.mxu1 %vm186_vm8, %v1257_v38 }
 0x140   :  { %1279 = vmatpush1.bf16.msra.mxu1 %v1259_v44  ;;  %1335 = vmatpush1.bf16.msra.mxu0 %v1315_v36 }
 0x141   :  { %v1830_v45 = vpop.permute.xlu1 %1829  ;;  %v1382_v46 = vpop.permute.xlu0 %1381  ;;  %1352 = vmatprep.mubr.bf16.mxu0 %v2046_v22 }
 0x142   :  { %v1385_v39 = vsel %vm370_vm11, %v2434_v41, %v1382_v46 }
 0x143   :  { %1968 = vmatmul.mubr.msk.bf16.vlgmr.msra.gmra.mxu1 %vm182_vm9, %v2449_v50  ;;  %v1388_v53 = vsel %vm186_vm8, %v1385_v39, 0 }
 0x144   :  { %1425 = vmatprep.mubr.bf16.mxu1 %v2046_v22 }
 0x145   :  { %v1384_v47 = vpop.permute.xlu1 %1383  ;;  %v1459_v48 = vpop.permute.xlu0 %1458 }
 0x146   :  { %v1386_v52 = vsel %vm370_vm11, %v1382_v46, %v1384_v47 }
 0x147   :  { %1970 = vmatmul.mubr.msk.bf16.vlgmr.msra.gmra.mxu0 %vm182_vm9, %v2337_v49  ;;  %1971 = vmatprep.subr.msk.bf16.mxu1 %vm186_vm8, %v1386_v52 }
 0x148   :  { %1408 = vmatpush1.bf16.msra.mxu1 %v1388_v53  ;;  %1500 = vmatprep.mubr.bf16.mxu0 %v2046_v22 }
 0x149   :  { %v1457_v50 = vpop.permute.xlu1 %1456  ;;  %v1532_v54 = vpop.permute.xlu0 %1531 }
 0x14a   :  { %v1460_v41 = vsel %vm502_vm12, %v2436_v42, %v1457_v50  ;;  %v1461_v55 = vsel %vm502_vm12, %v1457_v50, %v1459_v48  ;;  %v1535_v49 = vsel %vm634_vm13, %v2438_v43, %v1532_v54 }
 0x14b   :  { %v1463_v56 = vsel %vm186_vm8, %v1460_v41, 0  ;;  %1972 = vmatmul.mubr.msk.bf16.vlgmr.msra.gmra.mxu1 %vm182_vm9, %v2463_v58  ;;  %1973 = vmatprep.subr.msk.bf16.mxu0 %vm186_vm8, %v1461_v55  ;;  %v1538_v42 = vsel %vm186_vm8, %v1535_v49, 0 }
 0x14c   :  { %1483 = vmatpush1.bf16.msra.mxu0 %v1463_v56  ;;  %1575 = vmatprep.mubr.bf16.mxu1 %v2046_v22 }
 0x14d   :  { %v1534_v57 = vpop.permute.xlu1 %1533  ;;  %v1609_v59 = vpop.permute.xlu0 %1608 }
 0x14e   :  { %v1536_v60 = vsel %vm634_vm13, %v1532_v54, %v1534_v57 }
 0x14f   :  { %1974 = vmatmul.mubr.msk.bf16.vlgmr.msra.gmra.mxu0 %vm182_vm9, %v2475_v4  ;;  %1975 = vmatprep.subr.msk.bf16.mxu1 %vm186_vm8, %v1536_v60 }
 0x150   :  { %1558 = vmatpush1.bf16.msra.mxu1 %v1538_v42  ;;  %1650 = vmatprep.mubr.bf16.mxu0 %v2046_v22 }
 0x151   :  { %v1607_v58 = vpop.permute.xlu1 %1606  ;;  %v1682_v61 = vpop.permute.xlu0 %1681 }
 0x152   :  { %v1610_v43 = vsel %vm766_vm14, %v2440_v32, %v1607_v58  ;;  %v1611_v63 = vsel %vm766_vm14, %v1607_v58, %v1609_v59  ;;  %v1685_v2 = vsel %vm898_vm15, %v2451_v51, %v1682_v61 }
 0x153   :  { %v1613_v0 = vsel %vm186_vm8, %v1610_v43, 0  ;;  %1976 = vmatmul.mubr.msk.bf16.vlgmr.msra.gmra.mxu1 %vm182_vm9, %v2486_v10  ;;  %1977 = vmatprep.subr.msk.bf16.mxu0 %vm186_vm8, %v1611_v63  ;;  %v1688_v32 = vsel %vm186_vm8, %v1685_v2, 0 }
 0x154   :  { %1633 = vmatpush1.bf16.msra.mxu0 %v1613_v0  ;;  %1725 = vmatprep.mubr.bf16.mxu1 %v2046_v22 }
 0x155   :  { %v1684_v4 = vpop.permute.xlu1 %1683  ;;  %v1759_v5 = vpop.permute.xlu0 %1758 }
 0x156   :  { %v1686_v6 = vsel %vm898_vm15, %v1682_v61, %v1684_v4 }
 0x157   :  { %1978 = vmatmul.mubr.msk.bf16.vlgmr.msra.gmra.mxu0 %vm182_vm9, %v2499_v16  ;;  %1979 = vmatprep.subr.msk.bf16.mxu1 %vm186_vm8, %v1686_v6 }
 0x158   :  { %1708 = vmatpush1.bf16.msra.mxu1 %v1688_v32  ;;  %1800 = vmatprep.mubr.bf16.mxu0 %v2046_v22 }
 0x159   :  { %v1757_v62 = vpop.permute.xlu1 %1756  ;;  %v1832_v7 = vpop.permute.xlu0 %1831 }
 0x15a   :  { %v1760_v51 = vsel %vm1030_vm1, %v2543_v18, %v1757_v62  ;;  %v1761_v10 = vsel %vm1030_vm1, %v1757_v62, %v1759_v5  ;;  %v1835_v11 = vsel %vm1162_vm3, %v1830_v45, %v1832_v7 }
 0x15b   :  { %v1763_v3 = vsel %vm186_vm8, %v1760_v51, 0  ;;  %1980 = vmatmul.mubr.msk.bf16.vlgmr.msra.gmra.mxu1 %vm182_vm9, %v2510_v17  ;;  %1981 = vmatprep.subr.msk.bf16.mxu0 %vm186_vm8, %v1761_v10  ;;  %v1838_v9 = vsel %vm186_vm8, %v1835_v11, 0 }
 0x15c   :  { %1783 = vmatpush1.bf16.msra.mxu0 %v1763_v3  ;;  %1875 = vmatprep.mubr.bf16.mxu1 %v2046_v22  ;;  %v286_v13 = vpop.f32.mrf.mxu1 }
 0x15d   :  { %v1834_v12 = vpop.permute.xlu1 %1833 }
 0x15e   :  { %v1836_v8 = vsel %vm1162_vm3, %v1832_v7, %v1834_v12  ;;  %v288_v16 = vpop.f32.mrf.mxu1 }
 0x15f   :  { %1982 = vmatmul.mubr.msk.bf16.vlgmr.msra.gmra.mxu0 %vm182_vm9, %v2529_v19  ;;  %1983 = vmatprep.subr.msk.bf16.mxu1 %vm186_vm8, %v1836_v8 }
 0x160   :  { %1858 = vmatpush1.bf16.msra.mxu1 %v1838_v9  ;;  %v290_v20 = vpop.f32.mrf.mxu1 }
 0x162   :  { %v291_v21 = vpop.f32.mrf.mxu1 }
 0x163   :  { %1984 = vmatmul.mubr.msk.bf16.vlgmr.msra.gmra.mxu1 %vm182_vm9, %v2540_v33 }
 0x1df   :  { %v227_v14 = vpop.f32.mrf.mxu0 }
 0x1e0   :  { %v287_v40 = vadd.f32 %v286_v13, %v227_v14 }
 0x1e1   :  { %v229_v22 = vpop.f32.mrf.mxu0 }
 0x1e2   :  { %v289_v33 = vadd.f32 %v288_v16, %v229_v22 }
 0x1e3   :  { %v231_v23 = vpop.f32.mrf.mxu0 }
 0x1e5   :  { %v232_v17 = vpop.f32.mrf.mxu0 }
 0x1e7   :  { %v416_v24 = vpop.f32.mrf.mxu0 }
 0x1e8   :  { %v423_v34 = vadd.f32 %v416_v24, %v287_v40 }
 0x1e9   :  { %v418_v25 = vpop.f32.mrf.mxu0 }
 0x1ea   :  { %v424_v37 = vadd.f32 %v418_v25, %v289_v33 }
 0x1eb   :  { %v420_v26 = vpop.f32.mrf.mxu0  ;;  %v548_v27 = vpop.f32.mrf.mxu1 }
 0x1ec   :  { %v555_v38 = vadd.f32 %v548_v27, %v423_v34 }
 0x1ed   :  { %v421_v28 = vpop.f32.mrf.mxu0  ;;  %v550_v15 = vpop.f32.mrf.mxu1 }
 0x1ee   :  { %v556_v46 = vadd.f32 %v550_v15, %v424_v37 }
 0x1ef   :  { %v552_v29 = vpop.f32.mrf.mxu1  ;;  %v680_v19 = vpop.f32.mrf.mxu0 }
 0x1f0   :  { %v687_v39 = vadd.f32 %v680_v19, %v555_v38 }
 0x1f1   :  { %v553_v1 = vpop.f32.mrf.mxu1  ;;  %v682_v35 = vpop.f32.mrf.mxu0 }
 0x1f2   :  { %v688_v52 = vadd.f32 %v682_v35, %v556_v46 }
 0x1f3   :  { %v684_v30 = vpop.f32.mrf.mxu0  ;;  %v812_v31 = vpop.f32.mrf.mxu1 }
 0x1f4   :  { %v819_v53 = vadd.f32 %v812_v31, %v687_v39 }
 0x1f5   :  { %v685_v18 = vpop.f32.mrf.mxu0  ;;  %v814_v36 = vpop.f32.mrf.mxu1 }
 0x1f6   :  { %v820_v41 = vadd.f32 %v814_v36, %v688_v52 }
 0x1f7   :  { %v816_v44 = vpop.f32.mrf.mxu1  ;;  %v944_v45 = vpop.f32.mrf.mxu0 }
 0x1f8   :  { %v951_v55 = vadd.f32 %v944_v45, %v819_v53 }
 0x1f9   :  { %v817_v47 = vpop.f32.mrf.mxu1  ;;  %v946_v48 = vpop.f32.mrf.mxu0 }
 0x1fa   :  { %v952_v57 = vadd.f32 %v946_v48, %v820_v41 }
 0x1fb   :  { %v948_v50 = vpop.f32.mrf.mxu0  ;;  %v1076_v54 = vpop.f32.mrf.mxu1 }
 0x1fc   :  { %v1083_v59 = vadd.f32 %v1076_v54, %v951_v55 }
 0x1fd   :  { %v949_v56 = vpop.f32.mrf.mxu0  ;;  %v1078_v49 = vpop.f32.mrf.mxu1 }
 0x1fe   :  { %v1084_v58 = vadd.f32 %v1078_v49, %v952_v57 }
 0x1ff   :  { %v1080_v60 = vpop.f32.mrf.mxu1  ;;  %v1208_v42 = vpop.f32.mrf.mxu0 }
 0x200   :  { %v1215_v61 = vadd.f32 %v1208_v42, %v1083_v59 }
 0x201   :  { %v1081_v43 = vpop.f32.mrf.mxu1  ;;  %v1210_v63 = vpop.f32.mrf.mxu0 }
 0x202   :  { %1217 = vst [vmem:[#allocation2] sm:$0xff] %v1215_v61  ;;  %v1216_v0 = vadd.f32 %v1210_v63, %v1084_v58  ;;  %v1223_v6 = vmul.f32 %v1215_v61, %v1215_v61 }
 0x203   :  { %v1212_v2 = vpop.f32.mrf.mxu0  ;;  %v1298_v4 = vpop.f32.mrf.mxu1 }
 0x204   :  { %1218 = vst [vmem:[#allocation2 + $0x8] sm:$0xff] %v1216_v0  ;;  %v1219_v5 = vadd.f32 %v1216_v0, %v1215_v61  ;;  %v1224_v32 = vmul.f32 %v1216_v0, %v1216_v0 }
 0x205   :  { %v1213_v62 = vpop.f32.mrf.mxu0  ;;  %v1300_v7 = vpop.f32.mrf.mxu1 }
 0x206   :  { %1220 = vadd.xlane.f32.xlu0 %v1219_v5  ;;  %v1225_v51 = vadd.f32 %v1224_v32, %v1223_v6 }
 0x207   :  { %v1302_v10 = vpop.f32.mrf.mxu1  ;;  %v1354_v3 = vpop.f32.mrf.mxu0 }
 0x208   :  { %1226 = vadd.xlane.f32.xlu1 %v1225_v51  ;;  %v1355_v26 = vadd.f32 %v1354_v3, %v1298_v4 }
 0x209   :  { %v1303_v11 = vpop.f32.mrf.mxu1  ;;  %v1356_v12 = vpop.f32.mrf.mxu0 }
 0x20a   :  { %v1357_v15 = vadd.f32 %v1356_v12, %v1300_v7 }
 0x20b   :  { %v1358_v8 = vpop.f32.mrf.mxu0  ;;  %v1427_v9 = vpop.f32.mrf.mxu1 }
 0x20c   :  { %v1434_v29 = vadd.f32 %v1427_v9, %v1355_v26 }
 0x20d   :  { %v1359_v13 = vpop.f32.mrf.mxu0  ;;  %v1429_v16 = vpop.f32.mrf.mxu1 }
 0x20e   :  { %v1435_v35 = vadd.f32 %v1429_v16, %v1357_v15 }
 0x20f   :  { %v1431_v20 = vpop.f32.mrf.mxu1  ;;  %v1502_v21 = vpop.f32.mrf.mxu0 }
 0x210   :  { %v1509_v40 = vadd.f32 %v1502_v21, %v1434_v29 }
 0x211   :  { %v1432_v14 = vpop.f32.mrf.mxu1  ;;  %v1504_v22 = vpop.f32.mrf.mxu0 }
 0x212   :  { %v1510_v33 = vadd.f32 %v1504_v22, %v1435_v35 }
 0x213   :  { %v1506_v23 = vpop.f32.mrf.mxu0  ;;  %v1577_v17 = vpop.f32.mrf.mxu1 }
 0x214   :  { %v1584_v34 = vadd.f32 %v1577_v17, %v1509_v40 }
 0x215   :  { %v1507_v24 = vpop.f32.mrf.mxu0  ;;  %v1579_v25 = vpop.f32.mrf.mxu1 }
 0x216   :  { %v1585_v37 = vadd.f32 %v1579_v25, %v1510_v33 }
 0x217   :  { %v1581_v27 = vpop.f32.mrf.mxu1  ;;  %v1652_v28 = vpop.f32.mrf.mxu0 }
 0x218   :  { %v1659_v38 = vadd.f32 %v1652_v28, %v1584_v34 }
 0x219   :  { %v1582_v19 = vpop.f32.mrf.mxu1  ;;  %v1654_v1 = vpop.f32.mrf.mxu0 }
 0x21a   :  { %v1660_v46 = vadd.f32 %v1654_v1, %v1585_v37 }
 0x21b   :  { %v1656_v30 = vpop.f32.mrf.mxu0  ;;  %v1727_v31 = vpop.f32.mrf.mxu1 }
 0x21c   :  { %v1734_v39 = vadd.f32 %v1727_v31, %v1659_v38 }
 0x21d   :  { %v1657_v18 = vpop.f32.mrf.mxu0  ;;  %v1729_v36 = vpop.f32.mrf.mxu1 }
 0x21e   :  { %v1735_v52 = vadd.f32 %v1729_v36, %v1660_v46 }
 0x21f   :  { %v1731_v44 = vpop.f32.mrf.mxu1  ;;  %v1802_v45 = vpop.f32.mrf.mxu0 }
 0x220   :  { %v1809_v53 = vadd.f32 %v1802_v45, %v1734_v39 }
 0x221   :  { %v1732_v47 = vpop.f32.mrf.mxu1  ;;  %v1804_v48 = vpop.f32.mrf.mxu0 }
 0x222   :  { %v1810_v41 = vadd.f32 %v1804_v48, %v1735_v52 }
 0x223   :  { %v1877_v50 = vpop.f32.mrf.mxu1  ;;  %v1806_v54 = vpop.f32.mrf.mxu0 }
 0x224   :  { %v1884_v55 = vadd.f32 %v1877_v50, %v1809_v53 }
 0x225   :  { %v1879_v56 = vpop.f32.mrf.mxu1  ;;  %v1807_v49 = vpop.f32.mrf.mxu0 }
 0x226   :  { %1887 = vst [vmem:[#allocation2 + $0x10] sm:$0xff] %v1884_v55  ;;  %v1885_v57 = vadd.f32 %v1879_v56, %v1810_v41  ;;  %v1893_v61 = vmul.f32 %v1884_v55, %v1884_v55 }
 0x227   :  { %v1881_v59 = vpop.f32.mrf.mxu1 }
 0x228   :  { %1888 = vst [vmem:[#allocation2 + $0x18] sm:$0xff] %v1885_v57  ;;  %v1889_v60 = vadd.f32 %v1885_v57, %v1884_v55  ;;  %v1894_v42 = vmul.f32 %v1885_v57, %v1885_v57 }
 0x229   :  { %v1882_v58 = vpop.f32.mrf.mxu1 }
 0x22a   :  { %1890 = vadd.xlane.f32.xlu0 %v1889_v60  ;;  %v1895_v43 = vadd.f32 %v1894_v42, %v1893_v61 }
 0x22e   :  { %1896 = vadd.xlane.f32.xlu0 %v1895_v43 }
 0x22f   :  { %2017 = shalt.err (!%p2014_p4)
}
 0x230   :  { %s2048_s20 = smov 256  }
 0x231   :  { %1914 = dma.vmem_to_hbm [thread:$0]  %s1909_s18, 512, %s2626_s3, [#allocation3], %s2048_s20, %s2048_s20, %s2031_s6  }
 0x28f   :  { %v1221_v63 = vpop.xlane.xlu0 %1220 }
 0x291   :  { %v1227_v2 = vpop.xlane.xlu1 %1226 }
 0x2b3   :  { %v1891_v0 = vpop.xlane.xlu0 %1890 }
 0x2b4   :  { %v1892_v5 = vadd.f32 %v1891_v0, %v1221_v63 }
 0x2b7   :  { %v1897_v4 = vpop.xlane.xlu0 %1896 }
 0x2b8   :  { %v1898_v6 = vadd.f32 %v1897_v4, %v1227_v2 }
 0x2ba   :  { %v1900_v32 = vsel %vm152_vm0, %v1892_v5, %v1898_v6 }
 0x2bb   :  { %1902 = vst.msk [vmem:[%s2627_s4] sm:$0xff] %vm343_vm2, %v1900_v32 }
 0x2bc   :  { %2026 = dma.done.wait [#allocation3], 512  }
 0x2bd   :  { %2027 = vsyncadd [#allocation3], 4294966784 }
 0x2be   :  { %1922 = vsyncpa [#allocation3], 1 }

</bundles_post_ra>
